<compile_context>
chip_gen: v7x
topology: tpu7x:2x2x1
jax: 0.10.0
libtpu: 0.0.40
codegen_flags: <defaults>
</compile_context>

<pallas_src>
import functools
import math

import jax
import jax.numpy as jnp
import numpy as np
from jax import lax
from jax.experimental import pallas as pl
from jax.experimental.pallas import tpu as pltpu

ACT_NONE, ACT_RELU, ACT_LEAKY = 0, 1, 2


# ----------------------------------------------------------------------------
# SuccessiveGroupSplit (the literal module spec) as a Pallas kernel
# ----------------------------------------------------------------------------
def _sgs_kernel(ngroups, Cg, x_ref, *o_refs):
    for g in range(ngroups):
        o_refs[g][...] = x_ref[:, g * Cg:(g + 1) * Cg, :]


def successive_group_split_pallas(x, ngroups):
    """torch.split(x, C // ngroups, dim=1) for NCHW x; lane-dense copy, tuple of outputs."""
    N, C, H, W = x.shape
    assert C % ngroups == 0
    Cg = C // ngroups
    L = H * W
    x3 = x.reshape(N, C, L)
    outs = pl.pallas_call(
        functools.partial(_sgs_kernel, ngroups, Cg),
        out_shape=tuple(jax.ShapeDtypeStruct((N, Cg, L), x.dtype) for _ in range(ngroups)),
        grid=(1,),
        in_specs=[pl.BlockSpec((N, C, L), lambda i: (0, 0, 0))],
        out_specs=tuple(pl.BlockSpec((N, Cg, L), lambda i: (0, 0, 0)) for _ in range(ngroups)),
    )(x3)
    return tuple(o.reshape(N, Cg, H, W) for o in outs)


# ----------------------------------------------------------------------------
# Boundary masks for 'SAME' convs in the flat (C, H*W) layout (numpy-only cache)
# ----------------------------------------------------------------------------
def _mask_np(K, H, W):
    p = K // 2
    L = H * W
    hh = np.repeat(np.arange(H), W)   # i // W
    ww = np.tile(np.arange(W), H)     # i %  W
    m = np.zeros((K * K, L), np.float32)
    t = 0
    for dy in range(K):
        for dx in range(K):
            sh = hh + dy - p
            sw = ww + dx - p
            m[t] = ((sh >= 0) & (sh < H) & (sw >= 0) & (sw < W)).astype(np.float32)
            t += 1
    return m


_MASK_NP_CACHE = {}


def _get_mask_np(K, H, W):
    key = (K, H, W)
    if key not in _MASK_NP_CACHE:
        _MASK_NP_CACHE[key] = _mask_np(K, H, W)      # numpy only -> safe across jit traces
    return _MASK_NP_CACHE[key]


# ----------------------------------------------------------------------------
# Host-side layer preparation (dw+pw folding, lane/sublane-friendly weight layout)
# ----------------------------------------------------------------------------
def _round_up(v, m):
    return ((v + m - 1) // m) * m


def _pack_dense(W_ock, bias, K, act, alpha, splits, use_bf16):
    """W_ock: (Cout, K*K, Cin).  Returns (meta, w_flat, b) with per-part sublane padding."""
    Cout, KK, Cin = int(W_ock.shape[0]), int(W_ock.shape[1]), int(W_ock.shape[2])
    if splits is None:
        splits = (Cin,)
    assert sum(splits) == Cin
    cols, parts = [], []
    off = 0
    for c in splits:
        c = int(c)
        Wp = W_ock[:, :, off:off + c]
        cp = c if K == 1 else _round_up(c, 8)        # pad tap row-block to full sublanes
        if cp != c:
            Wp = jnp.pad(Wp, ((0, 0), (0, 0), (0, cp - c)))
        cols.append(Wp.reshape(Cout, KK * cp))
        parts.append((c, cp))
        off += c
    w = cols[0] if len(cols) == 1 else jnp.concatenate(cols, axis=1)
    if use_bf16:
        w = w.astype(jnp.bfloat16)                   # pre-cast host-side: halves weight DMA
    meta = (K, act, float(alpha), Cout, tuple(parts))
    return meta, w, bias.reshape(Cout, 1).astype(jnp.float32)


def _dense_entry(wb, act, alpha, splits, use_bf16):
    w, b = wb                                        # (K,K,Cin,Cout), (1,1,Cout)
    K, Cin, Cout = int(w.shape[0]), int(w.shape[2]), int(w.shape[3])
    W_ock = jnp.transpose(w.reshape(K * K, Cin, Cout), (2, 0, 1))
    return _pack_dense(W_ock, b.reshape(Cout), K, act, alpha, splits, use_bf16)


def _folded_entry(dw, pw, act, alpha, splits, use_bf16):
    """Fold depthwise KxK + 1x1 pointwise into one dense KxK conv (exact: no act in between)."""
    wd, bd = dw                                      # (K,K,C), (1,1,C)
    wp, bp = pw                                      # (1,1,C,Cout), (1,1,Cout)
    K, C, Cout = int(wd.shape[0]), int(wd.shape[2]), int(wp.shape[3])
    Wpw = jnp.transpose(wp.reshape(C, Cout))         # (Cout, C)
    Wdw = wd.reshape(K * K, C)                       # (K*K, C)
    W_ock = Wpw[:, None, :] * Wdw[None, :, :]        # (Cout, K*K, C)
    b_eff = bp.reshape(Cout) + jnp.sum(Wpw * bd.reshape(1, C), axis=1)
    return _pack_dense(W_ock, b_eff, K, act, alpha, splits, use_bf16)


def prepare_wossm(params, use_bf16=False):
    """Fold / re-lay-out all weights once (outside jit).  Returns (static_cfg, flat_weight_list)."""
    hid = int(params["pan_proj"][0][0].shape[3])
    block_num = len(params["blocks"])
    assert block_num >= 2

    flat_w = []

    def reg(entry):
        meta, w, b = entry
        idx = len(flat_w) // 2
        flat_w.extend([w, b])
        return (idx,) + meta

    pan_chain = tuple(
        reg(_dense_entry(p, act, 0.0, None, use_bf16))
        for p, act in zip(params["pan_proj"], (ACT_RELU, ACT_RELU, ACT_NONE)))

    block_chains = []
    for bp in params["blocks"]:
        in_ch = int(bp["dw_a"][0].shape[2])
        cx = in_ch - hid                             # channels of x; remaining `hid` are pan_f
        block_chains.append((
            reg(_folded_entry(bp["dw_a"], bp["pw_a"], ACT_NONE, 0.0, (cx, hid), use_bf16)),
            reg(_folded_entry(bp["dw_b"], bp["pw_b"], ACT_LEAKY, 0.2, None, use_bf16)),
            reg(_folded_entry(bp["dw_c"], bp["pw_c"], ACT_NONE, 0.0, None, use_bf16)),
            reg(_folded_entry(bp["dw_d"], bp["pw_d"], ACT_NONE, 0.0, None, use_bf16)),
            reg(_dense_entry(bp["pw_e"], ACT_NONE, 0.0, None, use_bf16)),
        ))

    gs_chains = []
    for gp in params["gs"]:
        gs_chains.append((
            reg(_folded_entry(gp["dw_a"], gp["pw_a"], ACT_NONE, 0.0, None, use_bf16)),
            reg(_folded_entry(gp["dw_b"], gp["pw_b"], ACT_NONE, 0.0, None, use_bf16)),
            reg(_folded_entry(gp["dw_c"], gp["pw_c"], ACT_NONE, 0.0, None, use_bf16)),
        ))

    merge_chains = []
    for mp in params["merge"]:
        cm = int(mp["dw_a"][0].shape[2])             # = 2*mid, split into [last | cur]
        merge_chains.append((
            reg(_folded_entry(mp["dw_a"], mp["pw_a"], ACT_LEAKY, 0.1,
                              (cm // 2, cm - cm // 2), use_bf16)),
            reg(_folded_entry(mp["dw_b"], mp["pw_b"], ACT_LEAKY, 0.1, None, use_bf16)),
            reg(_dense_entry(mp["pw_c"], ACT_NONE, 0.0, None, use_bf16)),
        ))

    tail_chain = (reg(_dense_entry(params["tail"], ACT_NONE, 0.0, None, use_bf16)),)

    all_layers = (pan_chain + sum(block_chains, ()) + sum(gs_chains, ())
                  + sum(merge_chains, ()) + tail_chain)
    scr_rows = 8
    for (_idx, K, _act, _alpha, _cout, parts) in all_layers:
        if K > 1:
            scr_rows = max(scr_rows, sum(K * K * cp for _c, cp in parts))

    cfg = dict(
        chains=dict(pan=pan_chain, blocks=tuple(block_chains), gs=tuple(gs_chains),
                    merge=tuple(merge_chains), tail=tail_chain),
        n_layers=len(flat_w) // 2,
        scr_rows=int(scr_rows),
        use_bf16=bool(use_bf16),
    )
    return cfg, flat_w


# ----------------------------------------------------------------------------
# The whole-forward fused Pallas kernel
# ----------------------------------------------------------------------------
def _wossm_kernel(cfg, H, W_img, *refs):
    L = H * W_img
    use_bf16 = cfg["use_bf16"]
    n_layers = cfg["n_layers"]
    chains = cfg["chains"]

    lms_ref, pan_ref, m3_ref, m5_ref = refs[0], refs[1], refs[2], refs[3]
    wb = refs[4:4 + 2 * n_layers]
    o_ref = refs[4 + 2 * n_layers]
    scr = refs[4 + 2 * n_layers + 1]
    mask_refs = {3: m3_ref, 5: m5_ref}

    def run_layer(lmeta, inputs):
        idx, K, act, alpha, Cout, parts = lmeta
        w = wb[2 * idx][...]
        b = wb[2 * idx + 1][...]                     # (Cout, 1) f32
        if K == 1:
            rhs = inputs[0]
            if use_bf16:
                rhs = rhs.astype(jnp.bfloat16)
            y = jnp.dot(w, rhs, preferred_element_type=jnp.float32) + b
        else:
            p = K // 2
            mref = mask_refs[K]
            row = 0
            for x, (c, cp) in zip(inputs, parts):
                t = 0
                for dy in range(K):
                    for dx in range(K):
                        off = (dy - p) * W_img + (dx - p)
                        xs = x if off == 0 else pltpu.roll(x, shift=(-off) % L, axis=1)
                        base = row + t * cp          # multiple of 8: aligned sublane store
                        scr[base:base + c, :] = xs * mref[t:t + 1, :]
                        if cp != c:                  # zero the padding rows of this tap block
                            scr[base + c:base + cp, :] = jnp.zeros((cp - c, L), jnp.float32)
                        t += 1
                row += K * K * cp
            rhs = scr[0:row, :]
            if use_bf16:
                rhs = rhs.astype(jnp.bfloat16)
            y = jnp.dot(w, rhs, preferred_element_type=jnp.float32) + b
        if act == ACT_RELU:
            y = jnp.maximum(y, 0.0)
        elif act == ACT_LEAKY:
            y = jnp.where(y >= 0.0, y, alpha * y)
        return y

    def run_chain(lmetas, first_inputs):
        x = run_layer(lmetas[0], first_inputs)
        for lm in lmetas[1:]:
            x = run_layer(lm, [x])
        return x

    # pan projection (kept resident in VMEM/vregs for all blocks)
    pan_f = run_chain(chains["pan"], [pan_ref[0]])

    # blocks: first layer takes [x, pan_f] with split weight columns (no HBM concat)
    x = lms_ref[0]
    band = []
    for bmetas in chains["blocks"]:
        x = run_chain(bmetas, [x, pan_f])
        band.append(x)

    # gs branches + merges (merge's first layer takes [last, cur])
    block_num = len(chains["blocks"])
    last = None
    for b_i in range(block_num - 1):
        if b_i == 0:
            last = run_chain(chains["gs"][0], [band[0]])
        cur = run_chain(chains["gs"][b_i + 1], [band[b_i + 1]])
        last = run_chain(chains["merge"][b_i], [last, cur])

    out = run_chain(chains["tail"], [last])
    o_ref[0] = out.astype(o_ref.dtype)


def wossm_forward_pallas(cfg, weights, lms_nchw, pan_nchw):
    """Whole woSSM forward as ONE pallas_call.  lms/pan are NCHW; output NCHW."""
    N, Cms, H, W = lms_nchw.shape
    Cp = pan_nchw.shape[1]
    L = H * W
    lms = lms_nchw.reshape(N, Cms, L)
    pan = pan_nchw.reshape(N, Cp, L)
    m3 = jnp.asarray(_get_mask_np(3, H, W))          # fresh constants per trace (no leak)
    m5 = jnp.asarray(_get_mask_np(5, H, W))

    in_specs = [
        pl.BlockSpec((1, Cms, L), lambda n: (n, 0, 0)),
        pl.BlockSpec((1, Cp, L), lambda n: (n, 0, 0)),
        pl.BlockSpec((9, L), lambda n: (0, 0)),
        pl.BlockSpec((25, L), lambda n: (0, 0)),
    ]
    for w in weights:
        in_specs.append(pl.BlockSpec(tuple(int(s) for s in w.shape), lambda n: (0, 0)))

    # TODO(synk): for large H,W add halo-overlap row-strip spatial tiling (v7x has 64 MiB VMEM).
    out = pl.pallas_call(
        functools.partial(_wossm_kernel, cfg, int(H), int(W)),
        out_shape=jax.ShapeDtypeStruct((N, Cms, L), jnp.float32),
        grid=(int(N),),
        in_specs=in_specs,
        out_specs=pl.BlockSpec((1, Cms, L), lambda n: (n, 0, 0)),
        scratch_shapes=[pltpu.VMEM((cfg["scr_rows"], L), jnp.float32)],
        compiler_params=pltpu.CompilerParams(
            dimension_semantics=("parallel",),       # batch across v7x's two TensorCores
            vmem_limit_bytes=32 * 1024 * 1024,
        ),
    )(lms, pan, m3, m5, *weights)
    return out.reshape(N, Cms, H, W)


# ----------------------------------------------------------------------------
# Pure-JAX reference (NHWC, lax.conv) — correctness oracle (un-folded weights)
# ----------------------------------------------------------------------------
def _apply_act_ref(y, act, alpha):
    if act == ACT_RELU:
        return jnp.maximum(y, 0.0)
    if act == ACT_LEAKY:
        return jnp.where(y >= 0.0, y, alpha * y)
    return y


def conv_ref(x, w, b, *, act=ACT_NONE, alpha=0.0, depthwise=False):
    K = w.shape[0]
    if depthwise:
        C = w.shape[-1]
        rhs = w.reshape(K, K, 1, C)
        y = lax.conv_general_dilated(
            x, rhs, (1, 1), "SAME",
            dimension_numbers=("NHWC", "HWIO", "NHWC"),
            feature_group_count=C, precision=lax.Precision.HIGHEST)
    else:
        y = lax.conv_general_dilated(
            x, w, (1, 1), "SAME",
            dimension_numbers=("NHWC", "HWIO", "NHWC"),
            precision=lax.Precision.HIGHEST)
    return _apply_act_ref(y + b, act, alpha)


def wossm_forward_ref(params, lms_nchw, pan_nchw):
    lms = jnp.transpose(lms_nchw, (0, 2, 3, 1))
    pan = jnp.transpose(pan_nchw, (0, 2, 3, 1))
    p0, p1, p2 = params["pan_proj"]
    pan = conv_ref(pan, *p0, act=ACT_RELU)
    pan = conv_ref(pan, *p1, act=ACT_RELU)
    pan = conv_ref(pan, *p2)

    def block(p, x):
        x = conv_ref(x, *p["dw_a"], depthwise=True)
        x = conv_ref(x, *p["pw_a"])
        x = conv_ref(x, *p["dw_b"], depthwise=True)
        x = conv_ref(x, *p["pw_b"], act=ACT_LEAKY, alpha=0.2)
        x = conv_ref(x, *p["dw_c"], depthwise=True)
        x = conv_ref(x, *p["pw_c"])
        x = conv_ref(x, *p["dw_d"], depthwise=True)
        x = conv_ref(x, *p["pw_d"])
        x = conv_ref(x, *p["pw_e"])
        return x

    def gs(p, x):
        x = conv_ref(x, *p["dw_a"], depthwise=True)
        x = conv_ref(x, *p["pw_a"])
        x = conv_ref(x, *p["dw_b"], depthwise=True)
        x = conv_ref(x, *p["pw_b"])
        x = conv_ref(x, *p["dw_c"], depthwise=True)
        x = conv_ref(x, *p["pw_c"])
        return x

    def merge(p, x):
        x = conv_ref(x, *p["dw_a"], depthwise=True)
        x = conv_ref(x, *p["pw_a"], act=ACT_LEAKY, alpha=0.1)
        x = conv_ref(x, *p["dw_b"], depthwise=True)
        x = conv_ref(x, *p["pw_b"], act=ACT_LEAKY, alpha=0.1)
        x = conv_ref(x, *p["pw_c"])
        return x

    band = []
    x = lms
    for bp in params["blocks"]:
        x = jnp.concatenate([x, pan], axis=-1)
        x = block(bp, x)
        band.append(x)

    block_num = len(params["blocks"])
    last = None
    for b_i in range(block_num - 1):
        if b_i == 0:
            last = gs(params["gs"][0], band[0])
        cur = gs(params["gs"][b_i + 1], band[b_i + 1])
        last = jnp.concatenate([last, cur], axis=-1)
        last = merge(params["merge"][b_i], last)
    out = conv_ref(last, *params["tail"])
    return jnp.transpose(out, (0, 3, 1, 2))


# ----------------------------------------------------------------------------
# Parameter construction (deterministic, mirrors woSSM.__init__ shapes)
# ----------------------------------------------------------------------------
def _init_dense(key, k, cin, cout):
    kw, kb = jax.random.split(key)
    w = jax.random.normal(kw, (k, k, cin, cout), jnp.float32) / math.sqrt(k * k * cin)
    b = 0.01 * jax.random.normal(kb, (1, 1, cout), jnp.float32)
    return (w, b)


def _init_dw(key, k, c):
    kw, kb = jax.random.split(key)
    w = jax.random.normal(kw, (k, k, c), jnp.float32) / float(k * k)
    b = 0.01 * jax.random.normal(kb, (1, 1, c), jnp.float32)
    return (w, b)


def init_params(key, in_ms_cnum, hidden_dim, block_num):
    mid = in_ms_cnum * hidden_dim
    keys = iter(jax.random.split(key, 512))
    nk = lambda: next(keys)
    params = {}
    params["pan_proj"] = [
        _init_dense(nk(), 3, 1, hidden_dim),
        _init_dense(nk(), 3, hidden_dim, hidden_dim),
        _init_dense(nk(), 5, hidden_dim, hidden_dim),
    ]
    blocks = []
    for i in range(block_num):
        in_ch = (in_ms_cnum + hidden_dim) if i == 0 else (mid + hidden_dim)
        blocks.append(dict(
            dw_a=_init_dw(nk(), 3, in_ch),
            pw_a=_init_dense(nk(), 1, in_ch, mid),
            dw_b=_init_dw(nk(), 3, mid),
            pw_b=_init_dense(nk(), 1, mid, mid),   # LeakyReLU(0.2) fused after this
            dw_c=_init_dw(nk(), 5, mid),
            pw_c=_init_dense(nk(), 1, mid, mid),
            dw_d=_init_dw(nk(), 3, mid),
            pw_d=_init_dense(nk(), 1, mid, mid),
            pw_e=_init_dense(nk(), 1, mid, mid),
        ))
    params["blocks"] = blocks
    gs = []
    for _ in range(block_num):
        gs.append(dict(
            dw_a=_init_dw(nk(), 3, mid),
            pw_a=_init_dense(nk(), 1, mid, mid),
            dw_b=_init_dw(nk(), 3, mid),
            pw_b=_init_dense(nk(), 1, mid, mid),
            dw_c=_init_dw(nk(), 5, mid),
            pw_c=_init_dense(nk(), 1, mid, mid),
        ))
    params["gs"] = gs
    merge = []
    for _ in range(block_num - 1):
        merge.append(dict(
            dw_a=_init_dw(nk(), 3, 2 * mid),
            pw_a=_init_dense(nk(), 1, 2 * mid, mid),  # LeakyReLU(0.1) fused
            dw_b=_init_dw(nk(), 3, mid),
            pw_b=_init_dense(nk(), 1, mid, mid),      # LeakyReLU(0.1) fused
            pw_c=_init_dense(nk(), 1, mid, mid),
        ))
    params["merge"] = merge
    params["tail"] = _init_dense(nk(), 3, mid, in_ms_cnum)
    return params


if __name__ == "__main__":
    in_ms_cnum, hidden_dim, block_num = 4, 4, 2
    N, H, W = 2, 16, 16

    key = jax.random.PRNGKey(0)
    kp, kl, kpan = jax.random.split(key, 3)
    params = init_params(kp, in_ms_cnum, hidden_dim, block_num)
    lms = jax.random.normal(kl, (N, in_ms_cnum, H, W), jnp.float32)   # NCHW
    pan = jax.random.normal(kpan, (N, 1, H, W), jnp.float32)          # NCHW

    # --- SuccessiveGroupSplit (literal module spec) --------------------------
    groups = successive_group_split_pallas(lms, ngroups=2)
    groups = tuple(g.block_until_ready() for g in groups)
    ref_groups = jnp.split(lms, 2, axis=1)
    for g, rg in zip(groups, ref_groups):
        assert g.shape == rg.shape
        if not np.array_equal(np.asarray(g), np.asarray(rg)):
            raise AssertionError("SuccessiveGroupSplit Pallas output mismatch")

    # --- fused whole-forward woSSM kernel (f32) -------------------------------
    cfg32, w32 = prepare_wossm(params, use_bf16=False)     # host-side fold/re-layout, done once
    fwd32 = jax.jit(functools.partial(wossm_forward_pallas, cfg32))
    out = jax.block_until_ready(fwd32(w32, lms, pan))
    assert out.shape == (N, in_ms_cnum, H, W), out.shape

    ref = jax.block_until_ready(wossm_forward_ref(params, lms, pan))
    if not np.allclose(np.asarray(out), np.asarray(ref), atol=5e-3, rtol=5e-3):
        max_err = float(np.max(np.abs(np.asarray(out) - np.asarray(ref))))
        raise AssertionError(f"Pallas output mismatch vs reference, max abs err={max_err}")

    # --- bf16 MXU-operand variant (weights pre-cast host-side); smoke test ----
    cfg16, w16 = prepare_wossm(params, use_bf16=True)
    fwd16 = jax.jit(functools.partial(wossm_forward_pallas, cfg16))
    out_bf16 = jax.block_until_ready(fwd16(w16, lms, pan))
    arr_bf16 = np.asarray(out_bf16)
    if not np.all(np.isfinite(arr_bf16)):
        raise AssertionError("bf16 Pallas output not finite")
    if float(np.max(np.abs(arr_bf16 - np.asarray(out)))) > 0.3:
        raise AssertionError("bf16 Pallas output diverges from f32 output")

    print("KERNEL_OK")
</pallas_src>

<mosaic_0001>
module attributes {stable_mosaic.version = 11 : i64} {
  func.func @_sgs_kernel(%arg0: i32, %arg1: memref<2x4x256xf32, #tpu.memory_space<vmem>>, %arg2: memref<2x2x256xf32, #tpu.memory_space<vmem>>, %arg3: memref<2x2x256xf32, #tpu.memory_space<vmem>>) attributes {dimension_semantics = [#tpu.dimension_semantics<arbitrary>], iteration_bounds = array<i64: 1>, scalar_prefetch = 0 : i64, scratch_operands = 0 : i64, tpu.core_type = #tpu.core_type<tc>, window_params = [{pipeline_mode = #tpu.pipeline_mode<synchronous>, transform_indices = @transform_0, window_bounds = array<i64: 2, 4, 256>}, {pipeline_mode = #tpu.pipeline_mode<synchronous>, transform_indices = @transform_1, window_bounds = array<i64: 2, 2, 256>}, {pipeline_mode = #tpu.pipeline_mode<synchronous>, transform_indices = @transform_2, window_bounds = array<i64: 2, 2, 256>}]} {
    %c0 = arith.constant 0 : index
    %c0_0 = arith.constant 0 : index
    %c0_1 = arith.constant 0 : index
    %0 = vector.load %arg1[%c0, %c0_0, %c0_1] : memref<2x4x256xf32, #tpu.memory_space<vmem>>, vector<2x2x256xf32>
    %c0_2 = arith.constant 0 : index
    %c0_3 = arith.constant 0 : index
    %c0_4 = arith.constant 0 : index
    %1 = vector.load %arg2[%c0_2, %c0_3, %c0_4] : memref<2x2x256xf32, #tpu.memory_space<vmem>>, vector<2x2x256xf32>
    tpu.vector_store %arg2[%c0_2, %c0_3, %c0_4], %0 {strides = array<i32>} : memref<2x2x256xf32, #tpu.memory_space<vmem>>, vector<2x2x256xf32>,
    %c0_5 = arith.constant 0 : index
    %c2 = arith.constant 2 : index
    %c0_6 = arith.constant 0 : index
    %2 = vector.load %arg1[%c0_5, %c2, %c0_6] : memref<2x4x256xf32, #tpu.memory_space<vmem>>, vector<2x2x256xf32>
    %c0_7 = arith.constant 0 : index
    %c0_8 = arith.constant 0 : index
    %c0_9 = arith.constant 0 : index
    %3 = vector.load %arg3[%c0_7, %c0_8, %c0_9] : memref<2x2x256xf32, #tpu.memory_space<vmem>>, vector<2x2x256xf32>
    tpu.vector_store %arg3[%c0_7, %c0_8, %c0_9], %2 {strides = array<i32>} : memref<2x2x256xf32, #tpu.memory_space<vmem>>, vector<2x2x256xf32>,
    return
  }
  func.func @transform_0(%arg0: i32) -> (i32, i32, i32) {
    %c0_i32 = arith.constant 0 : i32
    %c0_i32_0 = arith.constant 0 : i32
    %c0_i32_1 = arith.constant 0 : i32
    %c0_i32_2 = arith.constant 0 : i32
    return %c0_i32, %c0_i32_0, %c0_i32_1 : i32, i32, i32
  }
  func.func @transform_1(%arg0: i32) -> (i32, i32, i32) {
    %c0_i32 = arith.constant 0 : i32
    %c0_i32_0 = arith.constant 0 : i32
    %c0_i32_1 = arith.constant 0 : i32
    %c0_i32_2 = arith.constant 0 : i32
    return %c0_i32, %c0_i32_0, %c0_i32_1 : i32, i32, i32
  }
  func.func @transform_2(%arg0: i32) -> (i32, i32, i32) {
    %c0_i32 = arith.constant 0 : i32
    %c0_i32_0 = arith.constant 0 : i32
    %c0_i32_1 = arith.constant 0 : i32
    %c0_i32_2 = arith.constant 0 : i32
    return %c0_i32, %c0_i32_0, %c0_i32_1 : i32, i32, i32
  }
}

</mosaic_0001>

<bundles_post_ra>
// kernel: tpu_custom_call.1
= control target key start
LH: loop header
LB: loop body
LE: loop exit
PB: predicated region body
PF: predicated region fallthrough
CT: control target
= control target key end

     0   :  { %8 = vsyncpa [#allocation3], 0  ;;  %s246_s0 = inlined_call_operand.hbm [shape: f32[2,4,256], index: 0, kind: input, shape index: {}]   ;;  %s247_s1 = inlined_call_operand.hbm [shape: f32[2,2,256], index: 1, kind: output, shape index: {0}]   ;;  %s248_s2 = inlined_call_operand.hbm [shape: f32[2,2,256], index: 2, kind: output, shape index: {1}]  }
   0x1   :  { %9 = vsyncpa [#allocation4], 0 }
   0x2   :  { %10 = vsyncpa [#allocation7], 0  ;;  %s188_s9 = smov [#allocation2]   ;;  %s116_s13 = scalar_lea.hbm %s246_s0, 256 }
   0x3   :  { %s16_s10 = sshll.u32 %s188_s9, 4  ;;  %p117_p0 = scmp.ne.s32.totalorder %s246_s0, %s116_s13  ;;  %s17_s10 = int_to_ptr.vmem [resolvable:$true] %s16_s10 }
   0x4   :  { %p120_p1 = scmp.lt.u32.totalorder %s116_s13, %s246_s0 }
   0x6   :  { %p122_p2 = pnand %p120_p1, %p117_p0 }
   0x8   :  { %125 = shalt.err (!%p122_p2)
}
   0x9   :  { %s126_s18 = scalar_lea.vmem %s17_s10, 256  ;;  %p131_p4 = scmp.lt.s32.totalorder %s17_s10, %s17_s10 }
   0xa   :  { %p127_p3 = scmp.ne.s32.totalorder %s17_s10, %s126_s18  ;;  %p132_p5 = scmp.lt.s32.totalorder %s126_s18, %s126_s18 }
   0xc   :  { %p133_p6 = por %p132_p5, %p131_p4 }
   0xe   :  { %p134_p7 = pnand %p133_p6, %p127_p3 }
  0x10   :  { %137 = shalt.err (!%p134_p7)
}
  0x11   :  { %s189_s19 = smov 128   ;;  %s190_s20 = smov 8  }
  0x12   :  { %22 = dma.hbm_to_vmem [thread:$0]  %s246_s0, 256, %s17_s10, [#allocation3], %s189_s19, %s189_s19, %s190_s20  }
  0x13   :  { %182 = dma.done.wait [#allocation3], 256  }
  0x14   :  { %183 = vsyncadd [#allocation3], 4294967040  ;;  %s191_s23 = smov [#allocation5]   ;;  %s192_s25 = smov [#allocation6]  }
  0x15   :  { %s77_s24 = sshll.u32 %s191_s23, 4  ;;  %v105_v0 = vld.sshfl [vmem:[#allocation2] sm:$0xf pattern:$0x76325410]  ;;  %s89_s26 = sshll.u32 %s192_s25, 4  ;;  %s78_s24 = int_to_ptr.vmem [resolvable:$true] %s77_s24  ;;  %s90_s26 = int_to_ptr.vmem [resolvable:$true] %s89_s26 }
  0x16   :  { %46 = vst [vmem:[#allocation5] sm:$0xf] %v105_v0  ;;  %v106_v1 = vld.sshfl [vmem:[#allocation2 + $0x8] sm:$0xf pattern:$0x76325410]  ;;  %p143_p9 = scmp.lt.s32.totalorder %s78_s24, %s78_s24 }
  0x17   :  { %47 = vst [vmem:[#allocation5 + $0x4] sm:$0xf] %v106_v1  ;;  %v107_v2 = vld.sshfl [vmem:[#allocation2] sm:$0xf0 pattern:$0x76325410] }
  0x18   :  { %v59_v3 = vcombine.high %v107_v2, %v107_v2  ;;  %v108_v4 = vld.sshfl [vmem:[#allocation2 + $0x8] sm:$0xf0 pattern:$0x76325410]  ;;  %s138_s27 = scalar_lea.vmem %s78_s24, 128 }
  0x19   :  { %p139_p8 = scmp.ne.s32.totalorder %s78_s24, %s138_s27  ;;  %p144_p10 = scmp.lt.s32.totalorder %s138_s27, %s138_s27 }
  0x1b   :  { %p145_p11 = por %p144_p10, %p143_p9 }
  0x1d   :  { %p146_p12 = pnand %p145_p11, %p139_p8 }
  0x1f   :  { %149 = shalt.err (!%p146_p12)
}
  0x20   :  { %s150_s29 = scalar_lea.hbm %s247_s1, 128 }
  0x21   :  { %p151_p13 = scmp.ne.s32.totalorder %s247_s1, %s150_s29  ;;  %p154_p0 = scmp.lt.u32.totalorder %s150_s29, %s247_s1 }
  0x23   :  { %p156_p1 = pnand %p154_p0, %p151_p13 }
  0x25   :  { %159 = shalt.err (!%p156_p1)
}
  0x26   :  { %s193_s6 = smov 64   ;;  %s194_s7 = smov 4   ;;  %v67_v5 = vcombine.high %v108_v4, %v108_v4  ;;  %70 = vst [vmem:[#allocation6] sm:$0xf] %v59_v3 }
  0x27   :  { %83 = dma.vmem_to_hbm [thread:$0]  %s78_s24, 128, %s247_s1, [#allocation4], %s193_s6, %s193_s6, %s194_s7  }
  0x28   :  { %71 = vst [vmem:[#allocation6 + $0x4] sm:$0xf] %v67_v5  ;;  %s160_s10 = scalar_lea.vmem %s90_s26, 128  ;;  %p165_p3 = scmp.lt.s32.totalorder %s90_s26, %s90_s26 }
  0x29   :  { %p161_p2 = scmp.ne.s32.totalorder %s90_s26, %s160_s10  ;;  %p166_p4 = scmp.lt.s32.totalorder %s160_s10, %s160_s10 }
  0x2b   :  { %p167_p5 = por %p166_p4, %p165_p3 }
  0x2d   :  { %p168_p6 = pnand %p167_p5, %p161_p2 }
  0x2f   :  { %171 = shalt.err (!%p168_p6)
}
  0x30   :  { %s172_s13 = scalar_lea.hbm %s248_s2, 128 }
  0x31   :  { %p173_p7 = scmp.ne.s32.totalorder %s248_s2, %s172_s13  ;;  %p176_p8 = scmp.lt.u32.totalorder %s172_s13, %s248_s2 }
  0x33   :  { %p178_p9 = pnand %p176_p8, %p173_p7 }
  0x35   :  { %181 = shalt.err (!%p178_p9)
}
  0x36   :  { %95 = dma.vmem_to_hbm [thread:$0]  %s90_s26, 128, %s248_s2, [#allocation7], %s193_s6, %s193_s6, %s194_s7  }
  0x37   :  { %184 = dma.done.wait [#allocation4], 128  }
  0x38   :  { %185 = vsyncadd [#allocation4], 4294967168 }
  0x39   :  { %186 = dma.done.wait [#allocation7], 128  }
  0x3a   :  { %187 = vsyncadd [#allocation7], 4294967168 }
  0x3b   :  { %102 = vsyncpa [#allocation3], 1 }
  0x3c   :  { %103 = vsyncpa [#allocation4], 1 }
  0x3d   :  { %104 = vsyncpa [#allocation7], 1 }

</bundles_post_ra>
